<compile_context>
chip_gen: v5e
topology: v5e:2x2
jax: 0.10.0
libtpu: 0.0.40
codegen_flags: <defaults>
</compile_context>

<pallas_src>
import functools

import jax
import jax.numpy as jnp
from jax.experimental import pallas as pl
from jax.experimental.pallas import tpu as pltpu


def _round_up(v: int, m: int) -> int:
    return (v + m - 1) // m * m


def _cdiv(a: int, b: int) -> int:
    return -(-a // b)


def _pad2(a, rows: int, cols: int):
    a = jnp.asarray(a)
    if a.ndim == 1:
        a = a.reshape(1, -1)
    r, c = a.shape
    if r == rows and c == cols:
        return a
    return jnp.pad(a, ((0, rows - r), (0, cols - c)))


def _vmem_budget_and_cap():
    cap = 64 * 1024 * 1024              # conservative fallback = v7x per-core VMEM
    try:
        cap = int(pltpu.get_tpu_info().vmem_capacity_bytes)
    except Exception:
        pass
    # ~70% of physical VMEM: ~45 MiB on v7x (64 MiB/TC), ~90 MiB on v5e/v6e (128 MiB).
    return (cap * 7) // 10, cap


def _internet_kernel(x_ref, t_ref, wl_ref, bl_ref, wg_ref, bg_ref, wb_ref,
                     o_ref, *acc, gate_on_mxu: bool, approx_sigmoid: bool):
    """One (tile_b, tile_n) output tile of (x@Wl+bl)*sigmoid(t@Wg+bg) + t@Wb."""

    def epilogue(lin_f32):
        lin = lin_f32 + bl_ref[...].astype(jnp.float32)
        t = t_ref[...].astype(jnp.float32)                 # (TB, 8), cols 3..7 == 0
        if gate_on_mxu:
            # Small-dim_in regime: the MXU is nearly idle after the main matmul,
            # so these K=8 pushes are ~free and keep the VALU slot clear.
            gate_pre = jnp.dot(t, wg_ref[...].astype(jnp.float32),
                               preferred_element_type=jnp.float32)
            gate_pre = gate_pre + bg_ref[...].astype(jnp.float32)
            bias = jnp.dot(t, wb_ref[...].astype(jnp.float32),
                           preferred_element_type=jnp.float32)
        else:
            # Large-dim_in regime: MXU is the binding unit, keep K=3 on the VPU.
            wg = wg_ref[...].astype(jnp.float32)           # (8, TN), rows 3..7 == 0
            wb = wb_ref[...].astype(jnp.float32)
            t0, t1, t2 = t[:, 0:1], t[:, 1:2], t[:, 2:3]
            gate_pre = (t0 * wg[0:1, :] + t1 * wg[1:2, :] + t2 * wg[2:3, :]
                        + bg_ref[...].astype(jnp.float32))
            bias = t0 * wb[0:1, :] + t1 * wb[1:2, :] + t2 * wb[2:3, :]
        e = jnp.exp(-gate_pre)                             # EUP
        if approx_sigmoid:
            gate = pl.reciprocal(1.0 + e, approx=True)     # EUP (no VALU divide)
        else:
            gate = 1.0 / (1.0 + e)
        o_ref[...] = (lin * gate + bias).astype(o_ref.dtype)

    if acc:
        # K (dim_in) grid axis present: accumulate partial products in f32 VMEM.
        acc_ref, = acc
        k = pl.program_id(2)

        @pl.when(k == 0)
        def _():
            acc_ref[...] = jnp.zeros_like(acc_ref)

        acc_ref[...] += jnp.dot(x_ref[...], wl_ref[...],
                                preferred_element_type=jnp.float32)

        @pl.when(k == pl.num_programs(2) - 1)
        def _():
            epilogue(acc_ref[...])
    else:
        epilogue(jnp.dot(x_ref[...], wl_ref[...],
                         preferred_element_type=jnp.float32))


class InterNetPallas:
    """Pads / casts the parameters once at construction; call with (x, t)."""

    def __init__(self, w_layer, b_layer, w_gate, b_gate, w_bias, *,
                 matmul_dtype=None, gate_on_mxu=None, approx_sigmoid=True,
                 batch_hint=256, vmem_budget_bytes=None):
        w_layer = jnp.asarray(w_layer)
        dim_in, dim_out = w_layer.shape
        self.dim_in, self.dim_out = dim_in, dim_out
        self.matmul_dtype = matmul_dtype
        self.approx_sigmoid = bool(approx_sigmoid)
        if gate_on_mxu is None:
            gate_on_mxu = dim_in <= 384        # VALU-bound regime -> use idle MXU
        self.gate_on_mxu = bool(gate_on_mxu)

        bytes_x = 4 if matmul_dtype is None else jnp.dtype(matmul_dtype).itemsize
        self._bytes_x = bytes_x
        k_align = 8 if matmul_dtype is None else max(8, 32 // bytes_x)

        budget, cap = _vmem_budget_and_cap()
        if vmem_budget_bytes is not None:
            budget = int(vmem_budget_bytes)
        self._budget, self._cap = budget, cap

        dim_in_p = _round_up(dim_in, k_align)
        dim_out_p = _round_up(dim_out, 128)

        def fp(tb, tn, tk, with_acc):
            f = 2 * tb * tk * bytes_x            # x tile           (double-buffered)
            f += 2 * tb * 128 * 4                # t tile           (8 lanes pad to 128)
            f += 2 * tk * tn * bytes_x           # W_layer tile
            f += 4 * 2 * 8 * tn * 4              # b_layer / W_gate / b_gate / W_bias
            f += 2 * tb * tn * 4                 # output tile
            if with_acc:
                f += tb * tn * 4                 # f32 accumulator scratch
            return f

        self._fp = fp

        # ---- plan tile_n / tile_k against a representative batch tile -------
        tb_plan = min(max(_round_up(batch_hint, 8), 8), 512)
        tile_n, tile_k = dim_out_p, dim_in_p
        tn_floor = min(dim_out_p, 128)
        tk_floor = min(dim_in_p, 512)
        # Shrink order: dim_out tile first (keeps x streamed once as long as
        # possible), then a K axis for very large dim_in; the batch tile only
        # shrinks per call, as a last resort.
        while fp(tb_plan, tile_n, tile_k, tile_k < dim_in_p) > budget:
            if tile_n > tn_floor:
                tile_n = max(tn_floor, _round_up(tile_n // 2, 128))
            elif tile_k > tk_floor:
                tile_k = max(tk_floor, _round_up(tile_k // 2, 128))
            else:
                break

        if tile_k < dim_in_p:                    # K grid axis: lane-aligned blocks
            tile_k = _round_up(tile_k, 128)
            dim_in_p = _round_up(dim_in_p, tile_k)
        dim_out_p = _round_up(dim_out_p, tile_n)

        self.tile_n, self.tile_k = tile_n, tile_k
        self.dim_in_p, self.dim_out_p = dim_in_p, dim_out_p
        self.num_k = dim_in_p // tile_k

        # ---- pad / cast parameters once (hoisted out of the per-call path) --
        wdt = w_layer.dtype if matmul_dtype is None else matmul_dtype
        self.w_layer = _pad2(w_layer, dim_in_p, dim_out_p).astype(wdt)
        self.b_layer = _pad2(b_layer, 1, dim_out_p).astype(jnp.float32)
        self.w_gate = _pad2(w_gate, 8, dim_out_p).astype(jnp.float32)   # zero rows 3..7
        self.b_gate = _pad2(b_gate, 1, dim_out_p).astype(jnp.float32)
        self.w_bias = _pad2(w_bias, 8, dim_out_p).astype(jnp.float32)   # zero rows 3..7

    def __call__(self, x, t):
        B, d_in = x.shape
        assert d_in == self.dim_in and t.shape[0] == B
        out_dtype = x.dtype
        B8 = _round_up(B, 8)
        tile_n, tile_k, num_k = self.tile_n, self.tile_k, self.num_k
        dim_out_p = self.dim_out_p

        # t: zero-pad the K dim to 8 so the MXU path contracts exact zeros.
        t_p = jnp.pad(t.astype(jnp.float32), ((0, 0), (0, 8 - t.shape[1])))
        # x: only copy when the contraction dim needs zero padding; the batch
        # remainder is handled by grid overhang (OOB rows dropped on store).
        x_p = x
        if self.dim_in_p != self.dim_in:
            x_p = jnp.pad(x_p, ((0, 0), (0, self.dim_in_p - self.dim_in)))
        if self.matmul_dtype is not None and x_p.dtype != self.matmul_dtype:
            x_p = x_p.astype(self.matmul_dtype)

        # ---- batch tile: as large as fits the VMEM budget --------------------
        tile_b = min(B8, 1024)
        while (self._fp(tile_b, tile_n, tile_k, num_k > 1) > self._budget
               and tile_b > 8):
            tile_b = max(8, _round_up(tile_b // 2, 8))
        num_b = _cdiv(B, tile_b)
        num_n = dim_out_p // tile_n

        # Megacore (v7x): guarantee >= 2 parallel grid iterations when possible.
        if num_b * num_n == 1 and B8 >= 16:
            tile_b = _round_up(_cdiv(B8, 2), 8)
            num_b = _cdiv(B, tile_b)

        # ---- grid order: re-stream the cheaper operand on the inner axis ----
        x_restream = B8 * self.dim_in_p * self._bytes_x * (num_n - 1)
        w_restream = self.dim_in_p * dim_out_p * self._bytes_x * (num_b - 1)
        batch_inner = x_restream <= w_restream
        if batch_inner:            # grid = (n, b, k): weights resident per n tile
            grid = (num_n, num_b, num_k)
            x_map = lambda n, b, k: (b, k)
            t_map = lambda n, b, k: (b, 0)
            w_map = lambda n, b, k: (k, n)
            c_map = lambda n, b, k: (0, n)
            o_map = lambda n, b, k: (b, n)
        else:                      # grid = (b, n, k): x resident per batch tile
            grid = (num_b, num_n, num_k)
            x_map = lambda b, n, k: (b, k)
            t_map = lambda b, n, k: (b, 0)
            w_map = lambda b, n, k: (k, n)
            c_map = lambda b, n, k: (0, n)
            o_map = lambda b, n, k: (b, n)

        scratch = [pltpu.VMEM((tile_b, tile_n), jnp.float32)] if num_k > 1 else []
        fp_bytes = self._fp(tile_b, tile_n, tile_k, num_k > 1)
        vmem_limit = int(min(0.9 * self._cap, max(32 * 1024 * 1024, 1.5 * fp_bytes)))

        kernel = functools.partial(_internet_kernel,
                                   gate_on_mxu=self.gate_on_mxu,
                                   approx_sigmoid=self.approx_sigmoid)

        # TODO(synk): if an xprof trace shows exposed DMA on the x/t streams for
        # tiny dim_in, bump those two specs to pipeline_mode=pl.Buffered(3).
        out_p = pl.pallas_call(
            kernel,
            out_shape=jax.ShapeDtypeStruct((B, dim_out_p), out_dtype),
            grid=grid,
            in_specs=[
                pl.BlockSpec((tile_b, tile_k), x_map),     # x
                pl.BlockSpec((tile_b, 8), t_map),          # t (K zero-padded to 8)
                pl.BlockSpec((tile_k, tile_n), w_map),     # W_layer
                pl.BlockSpec((1, tile_n), c_map),          # b_layer
                pl.BlockSpec((8, tile_n), c_map),          # W_gate
                pl.BlockSpec((1, tile_n), c_map),          # b_gate
                pl.BlockSpec((8, tile_n), c_map),          # W_bias
            ],
            out_specs=pl.BlockSpec((tile_b, tile_n), o_map),
            scratch_shapes=scratch,
            compiler_params=pltpu.CompilerParams(
                dimension_semantics=("parallel", "parallel", "arbitrary"),
                vmem_limit_bytes=vmem_limit,
            ),
        )(x_p, t_p, self.w_layer, self.b_layer, self.w_gate, self.b_gate,
          self.w_bias)

        return out_p if dim_out_p == self.dim_out else out_p[:, :self.dim_out]


def internet_forward(x, t, w_layer, b_layer, w_gate, b_gate, w_bias, **kwargs):
    """One-shot convenience wrapper (re-pads the weights every call).

    For repeated calls build `InterNetPallas(...)` once and reuse it — that
    hoists the weight padding / casting out of the per-call path.
    """
    kwargs.setdefault("batch_hint", x.shape[0])
    return InterNetPallas(w_layer, b_layer, w_gate, b_gate, w_bias, **kwargs)(x, t)


def reference_forward(x, t, w_layer, b_layer, w_gate, b_gate, w_bias):
    hp = jax.lax.Precision.HIGHEST
    gate_pre = jnp.dot(t, w_gate, precision=hp) + jnp.reshape(b_gate, (1, -1))
    gate = 1.0 / (1.0 + jnp.exp(-gate_pre))
    bias = jnp.dot(t, w_bias, precision=hp)
    lin = jnp.dot(x, w_layer, precision=hp) + jnp.reshape(b_layer, (1, -1))
    return lin * gate + bias


if __name__ == "__main__":
    def make_inputs(key, B, dim_in, dim_out):
        kx, kt, k1, k2, k3, k4, k5 = jax.random.split(key, 7)
        x = jax.random.normal(kx, (B, dim_in), dtype=jnp.float32)
        t = jax.random.normal(kt, (B, 3), dtype=jnp.float32)
        w_layer = jax.random.normal(k1, (dim_in, dim_out), dtype=jnp.float32) * 0.1
        b_layer = jax.random.normal(k2, (dim_out,), dtype=jnp.float32) * 0.1
        w_gate = jax.random.normal(k3, (3, dim_out), dtype=jnp.float32) * 0.1
        b_gate = jax.random.normal(k4, (dim_out,), dtype=jnp.float32) * 0.1
        w_bias = jax.random.normal(k5, (3, dim_out), dtype=jnp.float32) * 0.1
        return x, t, w_layer, b_layer, w_gate, b_gate, w_bias

    key = jax.random.PRNGKey(0)
    ka, kb, kc = jax.random.split(key, 3)

    # 1) Small shapes consistent with the module (B=8, dim_in=32, dim_out=32);
    #    default config: gate/bias contractions on the MXU, approx EUP sigmoid.
    x, t, *params = make_inputs(ka, 8, 32, 32)
    net = InterNetPallas(*params, batch_hint=8)
    out = jax.block_until_ready(net(x, t))
    ref = reference_forward(x, t, *params)
    assert out.shape == ref.shape
    assert jnp.allclose(out, ref, atol=5e-3, rtol=5e-3), "small-shape mismatch"

    # 2) Non-aligned shapes (B=300, dim_in=40, dim_out=200): batch overhang,
    #    dim_out padding, megacore batch split, VPU gate path, exact sigmoid.
    x, t, *params = make_inputs(kb, 300, 40, 200)
    net = InterNetPallas(*params, gate_on_mxu=False, approx_sigmoid=False)
    out = jax.block_until_ready(net(x, t))
    ref = reference_forward(x, t, *params)
    assert out.shape == ref.shape
    assert jnp.allclose(out, ref, atol=5e-3, rtol=5e-3), "tiled-shape mismatch"

    # 3) bf16 streaming for the dominant x / W_layer HBM traffic (f32 accum).
    x, t, *params = make_inputs(kc, 128, 64, 256)
    net = InterNetPallas(*params, matmul_dtype=jnp.bfloat16)
    out = jax.block_until_ready(net(x, t))
    ref = reference_forward(x, t, *params)
    assert out.shape == ref.shape
    assert jnp.allclose(out, ref, atol=3e-2, rtol=3e-2), "bf16-path mismatch"

    print("KERNEL_OK")
</pallas_src>

<mosaic_0001>
module attributes {stable_mosaic.version = 11 : i64} {
  func.func @_internet_kernel(%arg0: i32, %arg1: i32, %arg2: i32, %arg3: memref<8x32xf32, #tpu.memory_space<vmem>>, %arg4: memref<8x8xf32, #tpu.memory_space<vmem>>, %arg5: memref<32x128xf32, #tpu.memory_space<vmem>>, %arg6: memref<1x128xf32, #tpu.memory_space<vmem>>, %arg7: memref<8x128xf32, #tpu.memory_space<vmem>>, %arg8: memref<1x128xf32, #tpu.memory_space<vmem>>, %arg9: memref<8x128xf32, #tpu.memory_space<vmem>>, %arg10: memref<8x128xf32, #tpu.memory_space<vmem>>) attributes {dimension_semantics = [#tpu.dimension_semantics<parallel>, #tpu.dimension_semantics<parallel>, #tpu.dimension_semantics<arbitrary>], iteration_bounds = array<i64: 1, 1, 1>, scalar_prefetch = 0 : i64, scratch_operands = 0 : i64, tpu.core_type = #tpu.core_type<tc>, window_params = [{transform_indices = @transform_0, window_bounds = array<i64: 8, 32>}, {transform_indices = @transform_1, window_bounds = array<i64: 8, 8>}, {transform_indices = @transform_2, window_bounds = array<i64: 32, 128>}, {transform_indices = @transform_3, window_bounds = array<i64: 1, 128>}, {transform_indices = @transform_4, window_bounds = array<i64: 8, 128>}, {transform_indices = @transform_5, window_bounds = array<i64: 1, 128>}, {transform_indices = @transform_6, window_bounds = array<i64: 8, 128>}, {transform_indices = @transform_7, window_bounds = array<i64: 8, 128>}]} {
    %c0 = arith.constant 0 : index
    %c0_0 = arith.constant 0 : index
    %0 = vector.load %arg3[%c0, %c0_0] : memref<8x32xf32, #tpu.memory_space<vmem>>, vector<8x32xf32>
    %c0_1 = arith.constant 0 : index
    %c0_2 = arith.constant 0 : index
    %1 = vector.load %arg5[%c0_1, %c0_2] : memref<32x128xf32, #tpu.memory_space<vmem>>, vector<32x128xf32>
    %cst = arith.constant dense<0.000000e+00> : vector<8x128xf32>
    %2 = tpu.matmul %0, %1, %cst {dimension_numbers = #tpu.dot_dimension_numbers<[1], [0], [0], [1], [0, 0, 1, 1], [], []>} : vector<8x32xf32>, vector<32x128xf32>, vector<8x128xf32> -> vector<8x128xf32>
    %c0_3 = arith.constant 0 : index
    %c0_4 = arith.constant 0 : index
    %3 = vector.load %arg6[%c0_3, %c0_4] : memref<1x128xf32, #tpu.memory_space<vmem>>, vector<1x128xf32>
    %4 = vector.broadcast %3 : vector<1x128xf32> to vector<8x128xf32>
    %5 = arith.addf %2, %4 : vector<8x128xf32>
    %c0_5 = arith.constant 0 : index
    %c0_6 = arith.constant 0 : index
    %6 = vector.load %arg4[%c0_5, %c0_6] : memref<8x8xf32, #tpu.memory_space<vmem>>, vector<8x8xf32>
    %c0_7 = arith.constant 0 : index
    %c0_8 = arith.constant 0 : index
    %7 = vector.load %arg7[%c0_7, %c0_8] : memref<8x128xf32, #tpu.memory_space<vmem>>, vector<8x128xf32>
    %cst_9 = arith.constant dense<0.000000e+00> : vector<8x128xf32>
    %8 = tpu.matmul %6, %7, %cst_9 {dimension_numbers = #tpu.dot_dimension_numbers<[1], [0], [0], [1], [0, 0, 1, 1], [], []>} : vector<8x8xf32>, vector<8x128xf32>, vector<8x128xf32> -> vector<8x128xf32>
    %c0_10 = arith.constant 0 : index
    %c0_11 = arith.constant 0 : index
    %9 = vector.load %arg8[%c0_10, %c0_11] : memref<1x128xf32, #tpu.memory_space<vmem>>, vector<1x128xf32>
    %10 = vector.broadcast %9 : vector<1x128xf32> to vector<8x128xf32>
    %11 = arith.addf %8, %10 : vector<8x128xf32>
    %c0_12 = arith.constant 0 : index
    %c0_13 = arith.constant 0 : index
    %12 = vector.load %arg9[%c0_12, %c0_13] : memref<8x128xf32, #tpu.memory_space<vmem>>, vector<8x128xf32>
    %cst_14 = arith.constant dense<0.000000e+00> : vector<8x128xf32>
    %13 = tpu.matmul %6, %12, %cst_14 {dimension_numbers = #tpu.dot_dimension_numbers<[1], [0], [0], [1], [0, 0, 1, 1], [], []>} : vector<8x8xf32>, vector<8x128xf32>, vector<8x128xf32> -> vector<8x128xf32>
    %cst_15 = arith.constant 0.000000e+00 : f32
    %14 = vector.broadcast %cst_15 : f32 to vector<8x128xf32>
    %15 = arith.subf %14, %11 : vector<8x128xf32>
    %16 = math.exp %15 : vector<8x128xf32>
    %cst_16 = arith.constant 1.000000e+00 : f32
    %17 = vector.broadcast %cst_16 : f32 to vector<8x128xf32>
    %18 = arith.addf %17, %16 : vector<8x128xf32>
    %19 = tpu.reciprocal %18 {approx = true} : vector<8x128xf32> -> vector<8x128xf32>
    %20 = arith.mulf %5, %19 : vector<8x128xf32>
    %21 = arith.addf %20, %13 : vector<8x128xf32>
    %c0_17 = arith.constant 0 : index
    %c0_18 = arith.constant 0 : index
    %22 = vector.load %arg10[%c0_17, %c0_18] : memref<8x128xf32, #tpu.memory_space<vmem>>, vector<8x128xf32>
    tpu.vector_store %arg10[%c0_17, %c0_18], %21 {strides = array<i32>} : memref<8x128xf32, #tpu.memory_space<vmem>>, vector<8x128xf32>,
    return
  }
  func.func @transform_0(%arg0: i32, %arg1: i32, %arg2: i32) -> (i32, i32) {
    %c0_i32 = arith.constant 0 : i32
    return %arg1, %arg2 : i32, i32
  }
  func.func @transform_1(%arg0: i32, %arg1: i32, %arg2: i32) -> (i32, i32) {
    %c0_i32 = arith.constant 0 : i32
    %c0_i32_0 = arith.constant 0 : i32
    return %arg1, %c0_i32 : i32, i32
  }
  func.func @transform_2(%arg0: i32, %arg1: i32, %arg2: i32) -> (i32, i32) {
    %c0_i32 = arith.constant 0 : i32
    return %arg2, %arg0 : i32, i32
  }
  func.func @transform_3(%arg0: i32, %arg1: i32, %arg2: i32) -> (i32, i32) {
    %c0_i32 = arith.constant 0 : i32
    %c0_i32_0 = arith.constant 0 : i32
    return %c0_i32, %arg0 : i32, i32
  }
  func.func @transform_4(%arg0: i32, %arg1: i32, %arg2: i32) -> (i32, i32) {
    %c0_i32 = arith.constant 0 : i32
    %c0_i32_0 = arith.constant 0 : i32
    return %c0_i32, %arg0 : i32, i32
  }
  func.func @transform_5(%arg0: i32, %arg1: i32, %arg2: i32) -> (i32, i32) {
    %c0_i32 = arith.constant 0 : i32
    %c0_i32_0 = arith.constant 0 : i32
    return %c0_i32, %arg0 : i32, i32
  }
  func.func @transform_6(%arg0: i32, %arg1: i32, %arg2: i32) -> (i32, i32) {
    %c0_i32 = arith.constant 0 : i32
    %c0_i32_0 = arith.constant 0 : i32
    return %c0_i32, %arg0 : i32, i32
  }
  func.func @transform_7(%arg0: i32, %arg1: i32, %arg2: i32) -> (i32, i32) {
    %c0_i32 = arith.constant 0 : i32
    return %arg1, %arg0 : i32, i32
  }
}

</mosaic_0001>

<bundles_post_ra>
// kernel: tpu_custom_call.1
= control target key start
LH: loop header
LB: loop body
LE: loop exit
PB: predicated region body
PF: predicated region fallthrough
CT: control target
= control target key end

     0   :  { %12 = vsyncpa [#allocation3], 0  ;;  %s449_s0 = inlined_call_operand.hbm [shape: f32[8,32], index: 0, kind: input, shape index: {}]   ;;  %s450_s1 = inlined_call_operand.hbm [shape: f32[8,8], index: 1, kind: input, shape index: {}]   ;;  %s451_s2 = inlined_call_operand.hbm [shape: f32[32,128], index: 2, kind: input, shape index: {}]   ;;  %s452_s3 = inlined_call_operand.vmem [shape: f32[1,128], index: 3, kind: input, shape index: {}]   ;;  %s453_s4 = inlined_call_operand.hbm [shape: f32[8,128], index: 4, kind: input, shape index: {}]   ;;  %s454_s5 = inlined_call_operand.vmem [shape: f32[1,128], index: 5, kind: input, shape index: {}]   ;;  %s455_s6 = inlined_call_operand.hbm [shape: f32[8,128], index: 6, kind: input, shape index: {}]   ;;  %s456_s7 = inlined_call_operand.hbm [shape: f32[8,128], index: 7, kind: output, shape index: {}]  }
   0x1   :  { %13 = vsyncpa [#allocation6], 0 }
   0x2   :  { %14 = vsyncpa [#allocation9], 0  ;;  %s32_s26 = sshll.u32 %s450_s1, 4  ;;  %s33_s26 = int_to_ptr.hbm [resolvable:$true] %s32_s26 }
   0x3   :  { %15 = vsyncpa [#allocation4], 0  ;;  %s377_s27 = smov [#allocation5]   ;;  %s58_s8 = sshll.u32 %s453_s4, 4  ;;  %s59_s8 = int_to_ptr.hbm [resolvable:$true] %s58_s8 }
   0x4   :  { %s34_s28 = sshll.u32 %s377_s27, 4  ;;  %s378_s9 = smov [#allocation8]   ;;  %s35_s28 = int_to_ptr.vmem [resolvable:$true] %s34_s28 }
   0x5   :  { %37 = dma.hbm_to_vmem [thread:$0]  %s33_s26, 128, %s35_s28, [#allocation6]  }
   0x6   :  { %s60_s10 = sshll.u32 %s378_s9, 4  ;;  %s21_s13 = sshll.u32 %s449_s0, 4  ;;  %s61_s10 = int_to_ptr.vmem [resolvable:$true] %s60_s10  ;;  %s22_s13 = int_to_ptr.hbm [resolvable:$true] %s21_s13 }
   0x7   :  { %63 = dma.hbm_to_vmem [thread:$0]  %s59_s8, 128, %s61_s10, [#allocation9]  }
   0x8   :  { %s42_s15 = sshll.u32 %s451_s2, 4  ;;  %s379_s16 = smov [#allocation2]   ;;  %s43_s15 = int_to_ptr.hbm [resolvable:$true] %s42_s15 }
   0x9   :  { %s23_s17 = sshll.u32 %s379_s16, 4  ;;  %s380_s4 = smov [#allocation7]   ;;  %s24_s17 = int_to_ptr.vmem [resolvable:$true] %s23_s17 }
   0xa   :  { %26 = dma.hbm_to_vmem [thread:$0]  %s22_s13, 128, %s24_s17, [#allocation3]  }
   0xb   :  { %s44_s18 = sshll.u32 %s380_s4, 4  ;;  %s381_s19 = smov 128   ;;  %s45_s18 = int_to_ptr.vmem [resolvable:$true] %s44_s18 }
   0xc   :  { %s382_s20 = smov 8   ;;  %s71_s22 = sshll.u32 %s455_s6, 4  ;;  %s72_s22 = int_to_ptr.hbm [resolvable:$true] %s71_s22 }
   0xd   :  { %50 = dma.hbm_to_vmem [thread:$0]  %s43_s15, 512, %s45_s18, [#allocation6], %s381_s19, %s381_s19, %s382_s20  }
   0xe   :  { %s383_s23 = smov [#allocation10]  }
   0xf   :  { %s73_s24 = sshll.u32 %s383_s23, 4  ;;  %s74_s24 = int_to_ptr.vmem [resolvable:$true] %s73_s24 }
  0x10   :  { %76 = dma.hbm_to_vmem [thread:$0]  %s72_s22, 128, %s74_s24, [#allocation9]  }
  0x11   :  { %369 = dma.done.wait [#allocation3], 128  }
  0x12   :  { %370 = vsyncadd [#allocation3], 4294967168 }
  0x13   :  { %371 = dma.done.wait [#allocation6], 640  }
  0x14   :  { %372 = vsyncadd [#allocation6], 4294966656 }
  0x15   :  { %373 = dma.done.wait [#allocation9], 256  }
  0x16   :  { %374 = vsyncadd [#allocation9], 4294967040  ;;  %vm136_vm0 = vcmask 64512   ;;  %v131_v0 = vld [vmem:[#allocation8] sm:$0xff]  ;;  %v130_v1 = vld [vmem:[#allocation5] sm:$0xff]  ;;  %vm106_vm1 = vcmask 261120  }
  0x17   :  { %v101_v2 = vld [vmem:[#allocation7 + $0x18] sm:$0xff]  ;;  %155 = vmatpush.msra.mxu1 %v131_v0  ;;  %v100_v3 = vld [vmem:[#allocation7 + $0x10] sm:$0xff]  ;;  %v160_v4 = vld [vmem:[#allocation10] sm:$0xff]  ;;  %s384_s27 = smov [#allocation11]   ;;  %s196_s30 = sshll.u32 %s456_s7, 4  ;;  %s197_s30 = int_to_ptr.hbm [resolvable:$true] %s196_s30 }
  0x18   :  { %122 = vmatpush.msra.mxu0 %v101_v2  ;;  %209 = vmatmul.msk.f32.vlgmr.msra.gmra.mxu1 %vm136_vm0, %v130_v1  ;;  %v99_v5 = vld [vmem:[#allocation7 + $0x8] sm:$0xff]  ;;  %v98_v6 = vld [vmem:[#allocation7] sm:$0xff]  ;;  %v97_v7 = vld [vmem:[#allocation2] sm:$0xff]  ;;  %s194_s28 = sshll.u32 %s384_s27, 4  ;;  %s195_s28 = int_to_ptr.vmem [resolvable:$true] %s194_s28 }
  0x19   :  { %176 = vmatpush.msra.mxu2 %v160_v4  ;;  %v219_v8 = vld [vmem:[%s454_s5] ss:$0 sm:$0xff] }
  0x1a   :  { %123 = vmatpush.msra.mxu0 %v100_v3  ;;  %210 = vmatmul.msk.f32.vlgmr.msra.gmra.mxu2 %vm136_vm0, %v130_v1  ;;  %v220_v15 = vld [vmem:[%s452_s3] ss:$0 sm:$0xff] }
  0x1c   :  { %124 = vmatpush.msra.mxu0 %v99_v5 }
  0x1e   :  { %125 = vmatpush.msra.mxu0 %v98_v6 }
  0x1f   :  { %208 = vmatmul.msk.f32.vlgmr.msra.gmra.mxu0 %vm106_vm1, %v97_v7 }
  0x95   :  { %v157_v9 = vpop.f32.mrf.mxu1 }
  0x96   :  { %v158_v10 = vadd.f32 %v219_v8, %v157_v9 }
  0x98   :  { %v181_v11 = vsub.f32 0.0, %v158_v10 }
  0x9a   :  { %v182_v12 = vmul.f32 1.442695, %v181_v11 }
  0x9c   :  { %221 = vpow2.f32 %v182_v12  ;;  %v127_v16 = vpop.f32.mrf.mxu0 }
  0x9d   :  { %v128_v17 = vadd.f32 %v220_v15, %v127_v16  ;;  %v178_v19 = vpop.f32.mrf.mxu2 }
  0xa2   :  { %v222_v13 = vpop.eup %221 }
  0xa3   :  { %v184_v14 = vadd.f32 1.0, %v222_v13 }
  0xa5   :  { %223 = vrcp.f32 %v184_v14 }
  0xab   :  { %v224_v18 = vpop.eup %223 }
  0xac   :  { %v186_v20 = vmul.f32 %v224_v18, %v128_v17 }
  0xae   :  { %v187_v21 = vadd.f32 %v186_v20, %v178_v19 }
  0xb0   :  { %188 = vst [vmem:[#allocation11] sm:$0xff] %v187_v21 }
  0xb1   :  { %199 = dma.vmem_to_hbm [thread:$0]  %s195_s28, 128, %s197_s30, [#allocation4]  }
  0xb2   :  { %375 = dma.done.wait [#allocation4], 128  }
  0xb3   :  { %376 = vsyncadd [#allocation4], 4294967168 }
  0xb4   :  { %204 = vsyncpa [#allocation3], 1 }
  0xb5   :  { %205 = vsyncpa [#allocation6], 1 }
  0xb6   :  { %206 = vsyncpa [#allocation9], 1 }
  0xb7   :  { %207 = vsyncpa [#allocation4], 1 }

</bundles_post_ra>
